<compile_context>
chip_gen: v6e
topology: v6e:2x2x1
jax: 0.10.0
libtpu: 0.0.40
codegen_flags: <defaults>
</compile_context>

<pallas_src>
import jax
import jax.numpy as jnp
from jax.experimental import pallas as pl
from jax.experimental.pallas import tpu as pltpu

MAX_LENGTH = 5
HIDDEN_SIZE = 32
OUTPUT_SIZE = 64   # vocabulary size (output_lang.n_words stand-in)
NUM_STEPS = 6      # decode steps handled by one kernel launch


def decoder_seq_kernel(tok_ref,                                   # scalar prefetch (SMEM)
                       emb_ref, hid0_ref, enc_ref,                # gathered emb row / init hidden / enc outs
                       attn_we_ref, attn_wh_ref,                  # attn Linear (split over the concat)
                       comb_we_ref, comb_wa_ref,                  # attn_combine Linear (split)
                       wih_ref, whh_ref,                          # fused GRU weights (H, 3H) each
                       outw_ref, bias_ref,                        # output Linear weight, packed biases
                       out_ref,                                   # fused (1,1,OUT_W) output row
                       h_scr):                                    # VMEM hidden-state carry
    t = pl.program_id(0)
    H = h_scr.shape[1]
    L = attn_we_ref.shape[1]
    V = outw_ref.shape[1]
    OUT_W = out_ref.shape[2]

    @pl.when(t == 0)
    def _():
        h_scr[...] = hid0_ref[...]

    embedded = emb_ref[0]          # (1, H) — row gathered by the emb BlockSpec index_map
    hidden = h_scr[...]            # (1, H) — carried across grid steps
    # TODO(synk): nn.Dropout is stochastic in train mode; treated as identity (eval/inference).

    # Unpack the lane-packed bias buffer with static slices:
    # layout = [ outb(V) | comb_b(H) | b_r(H) | b_z(H) | b_in(H) | b_hn(H) | attn_b(L) | pad ]
    o = 0
    outb = bias_ref[:, o:o + V]; o += V
    comb_b = bias_ref[:, o:o + H]; o += H
    b_r = bias_ref[:, o:o + H]; o += H
    b_z = bias_ref[:, o:o + H]; o += H
    b_in = bias_ref[:, o:o + H]; o += H
    b_hn = bias_ref[:, o:o + H]; o += H
    attn_b = bias_ref[:, o:o + L]

    # attention weights: softmax(W_attn @ cat(embedded, hidden) + b)
    attn_logits = (jnp.dot(embedded, attn_we_ref[...], preferred_element_type=jnp.float32)
                   + jnp.dot(hidden, attn_wh_ref[...], preferred_element_type=jnp.float32)
                   + attn_b)                                        # (1, L)
    m = jnp.max(attn_logits, axis=1, keepdims=True)
    e = jnp.exp(attn_logits - m)
    attn_w = e / jnp.sum(e, axis=1, keepdims=True)                  # (1, L)

    # attn_applied = attn_w @ encoder_outputs
    attn_applied = jnp.dot(attn_w, enc_ref[...],
                           preferred_element_type=jnp.float32)      # (1, H)

    # attn_combine on cat(embedded, attn_applied), then ReLU
    x = (jnp.dot(embedded, comb_we_ref[...], preferred_element_type=jnp.float32)
         + jnp.dot(attn_applied, comb_wa_ref[...], preferred_element_type=jnp.float32)
         + comb_b)
    x = jnp.maximum(x, 0.0)                                         # (1, H)

    # single-step GRU, fused gate matmuls (PyTorch ordering: reset, update, new)
    gi = jnp.dot(x, wih_ref[...], preferred_element_type=jnp.float32)       # (1, 3H)
    gh = jnp.dot(hidden, whh_ref[...], preferred_element_type=jnp.float32)  # (1, 3H)
    r = jax.nn.sigmoid(gi[:, 0:H] + gh[:, 0:H] + b_r)
    z = jax.nn.sigmoid(gi[:, H:2 * H] + gh[:, H:2 * H] + b_z)
    n = jnp.tanh(gi[:, 2 * H:3 * H] + b_in + r * (gh[:, 2 * H:3 * H] + b_hn))
    h_new = (1.0 - z) * n + z * hidden                              # (1, H)

    # output projection + log_softmax
    logits = jnp.dot(h_new, outw_ref[...], preferred_element_type=jnp.float32) + outb
    lm = jnp.max(logits, axis=1, keepdims=True)
    shifted = logits - lm
    logp = shifted - jnp.log(jnp.sum(jnp.exp(shifted), axis=1, keepdims=True))

    # carry hidden to next step
    h_scr[...] = h_new

    # fused lane-dense output row: [logp(V) | h_new(H) | attn_w(L) | zero pad]
    out_ref[...] = jnp.zeros_like(out_ref)
    out_ref[0, :, 0:V] = logp
    out_ref[0, :, V:V + H] = h_new
    out_ref[0, :, V + H:V + H + L] = attn_w


def init_params(key, hidden_size=HIDDEN_SIZE, output_size=OUTPUT_SIZE, max_length=MAX_LENGTH):
    H, V, L = hidden_size, output_size, max_length
    keys = jax.random.split(key, 12)
    u = lambda k, shape, scale: jax.random.uniform(k, shape, jnp.float32, -scale, scale)

    emb = u(keys[0], (V, H), 1.0)

    # attn: Linear(2H -> L); weight (L, 2H) -> transposed (2H, L), split over the concat.
    attn_wT = u(keys[1], (2 * H, L), 1.0 / jnp.sqrt(2 * H))
    attn_b = u(keys[2], (1, L), 1.0 / jnp.sqrt(2 * H))
    # attn_combine: Linear(2H -> H)
    comb_wT = u(keys[3], (2 * H, H), 1.0 / jnp.sqrt(2 * H))
    comb_b = u(keys[4], (1, H), 1.0 / jnp.sqrt(2 * H))
    # GRU: weight_ih (3H, H), weight_hh (3H, H), biases (3H,) -> kept fused & transposed.
    wih_T = u(keys[5], (H, 3 * H), 1.0 / jnp.sqrt(H))
    whh_T = u(keys[6], (H, 3 * H), 1.0 / jnp.sqrt(H))
    bih = u(keys[7], (1, 3 * H), 1.0 / jnp.sqrt(H))
    bhh = u(keys[8], (1, 3 * H), 1.0 / jnp.sqrt(H))
    # out: Linear(H -> V)
    out_wT = u(keys[9], (H, V), 1.0 / jnp.sqrt(H))
    out_b = u(keys[10], (1, V), 1.0 / jnp.sqrt(H))

    return dict(
        emb=emb,
        attn_we=attn_wT[:H], attn_wh=attn_wT[H:], attn_b=attn_b,
        comb_we=comb_wT[:H], comb_wa=comb_wT[H:], comb_b=comb_b,
        wih_T=wih_T, whh_T=whh_T, bih=bih, bhh=bhh,
        outw=out_wT, outb=out_b,
    )


def decoder_forward_sequence(tokens, hidden0, encoder_outputs, p):
    """Runs T decode steps of the Decoder in a single pallas_call.

    tokens: (T,) int32, hidden0: (1,1,H) f32, encoder_outputs: (L,H) f32.
    Returns (log_probs (T,V), hidden_seq (T,H), attn_weights (T,L)).
    """
    T = tokens.shape[0]
    H = hidden0.shape[-1]
    V = p["emb"].shape[0]
    L = encoder_outputs.shape[0]

    # Pre-fold biases where legal; bin/bhn stay separate (bhn lives inside r*(h@whn+bhn)).
    b_r = p["bih"][:, 0:H] + p["bhh"][:, 0:H]
    b_z = p["bih"][:, H:2 * H] + p["bhh"][:, H:2 * H]
    b_in = p["bih"][:, 2 * H:3 * H]
    b_hn = p["bhh"][:, 2 * H:3 * H]
    packed = jnp.concatenate(
        [p["outb"], p["comb_b"], b_r, b_z, b_in, b_hn, p["attn_b"]], axis=1)
    pack_w = 128 * pl.cdiv(packed.shape[1], 128)
    bias_pack = jnp.pad(packed, ((0, 0), (0, pack_w - packed.shape[1])))

    out_w = 128 * pl.cdiv(V + H + L, 128)      # lane-dense fused output width

    emb3 = p["emb"].reshape(V, 1, H)           # (V,1,H) so the gathered block is (1,1,H)
    hid2d = hidden0.reshape(1, H)

    inputs = [emb3, hid2d, encoder_outputs,
              p["attn_we"], p["attn_wh"],
              p["comb_we"], p["comb_wa"],
              p["wih_T"], p["whh_T"],
              p["outw"], bias_pack]

    def const_spec(shape):
        nd = len(shape)
        return pl.BlockSpec(shape, lambda t, tok, _nd=nd: (0,) * _nd)

    in_specs = [pl.BlockSpec((1, 1, H), lambda t, tok: (tok[t], 0, 0))]   # emb row gather
    in_specs += [const_spec(x.shape) for x in inputs[1:]]                 # VMEM-resident weights

    grid_spec = pltpu.PrefetchScalarGridSpec(
        num_scalar_prefetch=1,
        grid=(T,),
        in_specs=in_specs,
        out_specs=pl.BlockSpec((1, 1, out_w), lambda t, tok: (t, 0, 0)),
        scratch_shapes=[pltpu.VMEM((1, H), jnp.float32)],   # hidden-state carry
    )

    fused = pl.pallas_call(
        decoder_seq_kernel,
        out_shape=jax.ShapeDtypeStruct((T, 1, out_w), jnp.float32),
        grid_spec=grid_spec,
        compiler_params=pltpu.CompilerParams(dimension_semantics=("arbitrary",)),
    )(tokens, *inputs)

    fused = fused.reshape(T, out_w)
    logp_seq = fused[:, 0:V]
    h_seq = fused[:, V:V + H]
    attn_seq = fused[:, V + H:V + H + L]
    return logp_seq, h_seq, attn_seq


def decoder_forward(token_id, hidden, encoder_outputs, p):
    """Single-step interface matching the original module signature."""
    logp_seq, h_seq, attn_seq = decoder_forward_sequence(
        token_id.reshape(1), hidden, encoder_outputs, p)
    H = hidden.shape[-1]
    return logp_seq, h_seq.reshape(1, 1, H), attn_seq


def decoder_reference_sequence(tokens, hidden0, enc, p):
    H = hidden0.shape[-1]

    def step(h, tok):
        emb = p["emb"][tok][None, :]
        attn_logits = emb @ p["attn_we"] + h @ p["attn_wh"] + p["attn_b"]
        aw = jax.nn.softmax(attn_logits, axis=1)
        applied = aw @ enc
        x = jax.nn.relu(emb @ p["comb_we"] + applied @ p["comb_wa"] + p["comb_b"])
        gi = x @ p["wih_T"]
        gh = h @ p["whh_T"]
        bih, bhh = p["bih"], p["bhh"]
        r = jax.nn.sigmoid(gi[:, 0:H] + bih[:, 0:H] + gh[:, 0:H] + bhh[:, 0:H])
        z = jax.nn.sigmoid(gi[:, H:2 * H] + bih[:, H:2 * H] + gh[:, H:2 * H] + bhh[:, H:2 * H])
        n = jnp.tanh(gi[:, 2 * H:] + bih[:, 2 * H:] + r * (gh[:, 2 * H:] + bhh[:, 2 * H:]))
        hn = (1.0 - z) * n + z * h
        logits = hn @ p["outw"] + p["outb"]
        return hn, (jax.nn.log_softmax(logits, axis=1), hn, aw)

    _, (logps, hs, aws) = jax.lax.scan(step, hidden0.reshape(1, H), tokens)
    return logps[:, 0], hs[:, 0], aws[:, 0]


if __name__ == "__main__":
    key = jax.random.PRNGKey(0)
    pkey, hkey, ekey, tkey = jax.random.split(key, 4)

    params = init_params(pkey)
    tokens = jax.random.randint(tkey, (NUM_STEPS,), 0, OUTPUT_SIZE, dtype=jnp.int32)
    hidden0 = jax.random.normal(hkey, (1, 1, HIDDEN_SIZE), jnp.float32)
    encoder_outputs = jax.random.normal(ekey, (MAX_LENGTH, HIDDEN_SIZE), jnp.float32)

    # multi-step fused decode (one pallas_call for the whole sequence)
    logp_seq, h_seq, attn_seq = decoder_forward_sequence(tokens, hidden0, encoder_outputs, params)
    jax.block_until_ready((logp_seq, h_seq, attn_seq))

    r_logp, r_h, r_attn = decoder_reference_sequence(tokens, hidden0, encoder_outputs, params)
    assert jnp.allclose(logp_seq, r_logp, atol=1e-4, rtol=1e-4)
    assert jnp.allclose(h_seq, r_h, atol=1e-4, rtol=1e-4)
    assert jnp.allclose(attn_seq, r_attn, atol=1e-4, rtol=1e-4)
    assert logp_seq.shape == (NUM_STEPS, OUTPUT_SIZE)
    assert h_seq.shape == (NUM_STEPS, HIDDEN_SIZE)
    assert attn_seq.shape == (NUM_STEPS, MAX_LENGTH)

    # single-step interface parity with the original nn.Module forward
    logp1, new_h1, attn1 = decoder_forward(tokens[:1], hidden0, encoder_outputs, params)
    jax.block_until_ready((logp1, new_h1, attn1))
    assert logp1.shape == (1, OUTPUT_SIZE)
    assert new_h1.shape == (1, 1, HIDDEN_SIZE)
    assert attn1.shape == (1, MAX_LENGTH)
    assert jnp.allclose(logp1, r_logp[:1], atol=1e-4, rtol=1e-4)

    print("KERNEL_OK")
</pallas_src>

<mosaic_0001>
module attributes {stable_mosaic.version = 11 : i64} {
  func.func @decoder_seq_kernel(%arg0: i32, %arg1: memref<6xi32, #tpu.memory_space<smem>>, %arg2: memref<1x1x32xf32, #tpu.memory_space<vmem>>, %arg3: memref<1x32xf32, #tpu.memory_space<vmem>>, %arg4: memref<5x32xf32, #tpu.memory_space<vmem>>, %arg5: memref<32x5xf32, #tpu.memory_space<vmem>>, %arg6: memref<32x5xf32, #tpu.memory_space<vmem>>, %arg7: memref<32x32xf32, #tpu.memory_space<vmem>>, %arg8: memref<32x32xf32, #tpu.memory_space<vmem>>, %arg9: memref<32x96xf32, #tpu.memory_space<vmem>>, %arg10: memref<32x96xf32, #tpu.memory_space<vmem>>, %arg11: memref<32x64xf32, #tpu.memory_space<vmem>>, %arg12: memref<1x256xf32, #tpu.memory_space<vmem>>, %arg13: memref<1x1x128xf32, #tpu.memory_space<vmem>>, %arg14: memref<1x32xf32, #tpu.memory_space<vmem>>) attributes {dimension_semantics = [#tpu.dimension_semantics<arbitrary>], iteration_bounds = array<i64: 6>, scalar_prefetch = 1 : i64, scratch_operands = 1 : i64, tpu.core_type = #tpu.core_type<tc>, window_params = [{transform_indices = @transform_0, window_bounds = array<i64: 1, 1, 32>}, {pipeline_mode = #tpu.pipeline_mode<synchronous>, transform_indices = @transform_1, window_bounds = array<i64: 1, 32>}, {pipeline_mode = #tpu.pipeline_mode<synchronous>, transform_indices = @transform_2, window_bounds = array<i64: 5, 32>}, {pipeline_mode = #tpu.pipeline_mode<synchronous>, transform_indices = @transform_3, window_bounds = array<i64: 32, 5>}, {pipeline_mode = #tpu.pipeline_mode<synchronous>, transform_indices = @transform_4, window_bounds = array<i64: 32, 5>}, {pipeline_mode = #tpu.pipeline_mode<synchronous>, transform_indices = @transform_5, window_bounds = array<i64: 32, 32>}, {pipeline_mode = #tpu.pipeline_mode<synchronous>, transform_indices = @transform_6, window_bounds = array<i64: 32, 32>}, {pipeline_mode = #tpu.pipeline_mode<synchronous>, transform_indices = @transform_7, window_bounds = array<i64: 32, 96>}, {pipeline_mode = #tpu.pipeline_mode<synchronous>, transform_indices = @transform_8, window_bounds = array<i64: 32, 96>}, {pipeline_mode = #tpu.pipeline_mode<synchronous>, transform_indices = @transform_9, window_bounds = array<i64: 32, 64>}, {pipeline_mode = #tpu.pipeline_mode<synchronous>, transform_indices = @transform_10, window_bounds = array<i64: 1, 256>}, {transform_indices = @transform_11, window_bounds = array<i64: 1, 1, 128>}]} {
    %c0_i32 = arith.constant 0 : i32
    %0 = arith.cmpi eq, %arg0, %c0_i32 : i32
    %1 = arith.extui %0 : i1 to i32
    %c0_i32_0 = arith.constant 0 : i32
    %2 = arith.cmpi ne, %1, %c0_i32_0 : i32
    scf.if %2 {
      %c0_59 = arith.constant 0 : index
      %c0_60 = arith.constant 0 : index
      %97 = vector.load %arg3[%c0_59, %c0_60] : memref<1x32xf32, #tpu.memory_space<vmem>>, vector<1x32xf32>
      %c0_61 = arith.constant 0 : index
      %c0_62 = arith.constant 0 : index
      %98 = vector.load %arg14[%c0_61, %c0_62] : memref<1x32xf32, #tpu.memory_space<vmem>>, vector<1x32xf32>
      tpu.vector_store %arg14[%c0_61, %c0_62], %97 {strides = array<i32>} : memref<1x32xf32, #tpu.memory_space<vmem>>, vector<1x32xf32>,
    } else {
    }
    %c0 = arith.constant 0 : index
    %c0_1 = arith.constant 0 : index
    %c0_2 = arith.constant 0 : index
    %3 = vector.load %arg2[%c0, %c0_1, %c0_2] : memref<1x1x32xf32, #tpu.memory_space<vmem>>, vector<1x1x32xf32>
    %4 = vector.shape_cast %3 : vector<1x1x32xf32> to vector<1x32xf32>
    %c0_3 = arith.constant 0 : index
    %c0_4 = arith.constant 0 : index
    %5 = vector.load %arg14[%c0_3, %c0_4] : memref<1x32xf32, #tpu.memory_space<vmem>>, vector<1x32xf32>
    %c0_5 = arith.constant 0 : index
    %c0_6 = arith.constant 0 : index
    %6 = vector.load %arg12[%c0_5, %c0_6] : memref<1x256xf32, #tpu.memory_space<vmem>>, vector<1x64xf32>
    %c0_7 = arith.constant 0 : index
    %c64 = arith.constant 64 : index
    %7 = vector.load %arg12[%c0_7, %c64] : memref<1x256xf32, #tpu.memory_space<vmem>>, vector<1x32xf32>
    %c0_8 = arith.constant 0 : index
    %c96 = arith.constant 96 : index
    %8 = vector.load %arg12[%c0_8, %c96] : memref<1x256xf32, #tpu.memory_space<vmem>>, vector<1x32xf32>
    %c0_9 = arith.constant 0 : index
    %c128 = arith.constant 128 : index
    %9 = vector.load %arg12[%c0_9, %c128] : memref<1x256xf32, #tpu.memory_space<vmem>>, vector<1x32xf32>
    %c0_10 = arith.constant 0 : index
    %c160 = arith.constant 160 : index
    %10 = vector.load %arg12[%c0_10, %c160] : memref<1x256xf32, #tpu.memory_space<vmem>>, vector<1x32xf32>
    %c0_11 = arith.constant 0 : index
    %c192 = arith.constant 192 : index
    %11 = vector.load %arg12[%c0_11, %c192] : memref<1x256xf32, #tpu.memory_space<vmem>>, vector<1x32xf32>
    %c0_12 = arith.constant 0 : index
    %c224 = arith.constant 224 : index
    %12 = vector.load %arg12[%c0_12, %c224] : memref<1x256xf32, #tpu.memory_space<vmem>>, vector<1x5xf32>
    %c0_13 = arith.constant 0 : index
    %c0_14 = arith.constant 0 : index
    %13 = vector.load %arg5[%c0_13, %c0_14] : memref<32x5xf32, #tpu.memory_space<vmem>>, vector<32x5xf32>
    %cst = arith.constant dense<0.000000e+00> : vector<1x5xf32>
    %14 = tpu.matmul %4, %13, %cst {dimension_numbers = #tpu.dot_dimension_numbers<[1], [0], [0], [1], [0, 0, 1, 1], [], []>} : vector<1x32xf32>, vector<32x5xf32>, vector<1x5xf32> -> vector<1x5xf32>
    %c0_15 = arith.constant 0 : index
    %c0_16 = arith.constant 0 : index
    %15 = vector.load %arg6[%c0_15, %c0_16] : memref<32x5xf32, #tpu.memory_space<vmem>>, vector<32x5xf32>
    %cst_17 = arith.constant dense<0.000000e+00> : vector<1x5xf32>
    %16 = tpu.matmul %5, %15, %cst_17 {dimension_numbers = #tpu.dot_dimension_numbers<[1], [0], [0], [1], [0, 0, 1, 1], [], []>} : vector<1x32xf32>, vector<32x5xf32>, vector<1x5xf32> -> vector<1x5xf32>
    %17 = arith.addf %14, %16 : vector<1x5xf32>
    %18 = arith.addf %17, %12 : vector<1x5xf32>
    %cst_18 = arith.constant dense<0xFF800000> : vector<1xf32>
    %19 = vector.multi_reduction <maximumf>, %18, %cst_18 [1] : vector<1x5xf32> to vector<1xf32>
    %20 = vector.shape_cast %19 : vector<1xf32> to vector<1x1xf32>
    %21 = vector.broadcast %20 : vector<1x1xf32> to vector<1x5xf32>
    %22 = arith.subf %18, %21 : vector<1x5xf32>
    %23 = math.exp %22 : vector<1x5xf32>
    %cst_19 = arith.constant dense<0.000000e+00> : vector<1xf32>
    %24 = vector.multi_reduction <add>, %23, %cst_19 [1] : vector<1x5xf32> to vector<1xf32>
    %25 = vector.shape_cast %24 : vector<1xf32> to vector<1x1xf32>
    %26 = vector.broadcast %25 : vector<1x1xf32> to vector<1x5xf32>
    %27 = arith.divf %23, %26 : vector<1x5xf32>
    %c0_20 = arith.constant 0 : index
    %c0_21 = arith.constant 0 : index
    %28 = vector.load %arg4[%c0_20, %c0_21] : memref<5x32xf32, #tpu.memory_space<vmem>>, vector<5x32xf32>
    %cst_22 = arith.constant dense<0.000000e+00> : vector<1x32xf32>
    %29 = tpu.matmul %27, %28, %cst_22 {dimension_numbers = #tpu.dot_dimension_numbers<[1], [0], [0], [1], [0, 0, 1, 1], [], []>} : vector<1x5xf32>, vector<5x32xf32>, vector<1x32xf32> -> vector<1x32xf32>
    %c0_23 = arith.constant 0 : index
    %c0_24 = arith.constant 0 : index
    %30 = vector.load %arg7[%c0_23, %c0_24] : memref<32x32xf32, #tpu.memory_space<vmem>>, vector<32x32xf32>
    %cst_25 = arith.constant dense<0.000000e+00> : vector<1x32xf32>
    %31 = tpu.matmul %4, %30, %cst_25 {dimension_numbers = #tpu.dot_dimension_numbers<[1], [0], [0], [1], [0, 0, 1, 1], [], []>} : vector<1x32xf32>, vector<32x32xf32>, vector<1x32xf32> -> vector<1x32xf32>
    %c0_26 = arith.constant 0 : index
    %c0_27 = arith.constant 0 : index
    %32 = vector.load %arg8[%c0_26, %c0_27] : memref<32x32xf32, #tpu.memory_space<vmem>>, vector<32x32xf32>
    %cst_28 = arith.constant dense<0.000000e+00> : vector<1x32xf32>
    %33 = tpu.matmul %29, %32, %cst_28 {dimension_numbers = #tpu.dot_dimension_numbers<[1], [0], [0], [1], [0, 0, 1, 1], [], []>} : vector<1x32xf32>, vector<32x32xf32>, vector<1x32xf32> -> vector<1x32xf32>
    %34 = arith.addf %31, %33 : vector<1x32xf32>
    %35 = arith.addf %34, %7 : vector<1x32xf32>
    %cst_29 = arith.constant 0.000000e+00 : f32
    %36 = vector.broadcast %cst_29 : f32 to vector<1x32xf32>
    %37 = arith.maximumf %35, %36 : vector<1x32xf32>
    %c0_30 = arith.constant 0 : index
    %c0_31 = arith.constant 0 : index
    %38 = vector.load %arg9[%c0_30, %c0_31] : memref<32x96xf32, #tpu.memory_space<vmem>>, vector<32x96xf32>
    %cst_32 = arith.constant dense<0.000000e+00> : vector<1x96xf32>
    %39 = tpu.matmul %37, %38, %cst_32 {dimension_numbers = #tpu.dot_dimension_numbers<[1], [0], [0], [1], [0, 0, 1, 1], [], []>} : vector<1x32xf32>, vector<32x96xf32>, vector<1x96xf32> -> vector<1x96xf32>
    %c0_33 = arith.constant 0 : index
    %c0_34 = arith.constant 0 : index
    %40 = vector.load %arg10[%c0_33, %c0_34] : memref<32x96xf32, #tpu.memory_space<vmem>>, vector<32x96xf32>
    %cst_35 = arith.constant dense<0.000000e+00> : vector<1x96xf32>
    %41 = tpu.matmul %5, %40, %cst_35 {dimension_numbers = #tpu.dot_dimension_numbers<[1], [0], [0], [1], [0, 0, 1, 1], [], []>} : vector<1x32xf32>, vector<32x96xf32>, vector<1x96xf32> -> vector<1x96xf32>
    %42 = vector.extract_strided_slice %39 {offsets = [0, 0], sizes = [1, 32], strides = [1, 1]} : vector<1x96xf32> to vector<1x32xf32>
    %43 = vector.extract_strided_slice %41 {offsets = [0, 0], sizes = [1, 32], strides = [1, 1]} : vector<1x96xf32> to vector<1x32xf32>
    %44 = arith.addf %42, %43 : vector<1x32xf32>
    %45 = arith.addf %44, %8 : vector<1x32xf32>
    %46 = arith.negf %45 : vector<1x32xf32>
    %47 = math.exp %46 : vector<1x32xf32>
    %cst_36 = arith.constant 1.000000e+00 : f32
    %48 = vector.broadcast %cst_36 : f32 to vector<1x32xf32>
    %49 = arith.addf %48, %47 : vector<1x32xf32>
    %50 = arith.divf %48, %49 : vector<1x32xf32>
    %51 = vector.extract_strided_slice %39 {offsets = [0, 32], sizes = [1, 32], strides = [1, 1]} : vector<1x96xf32> to vector<1x32xf32>
    %52 = vector.extract_strided_slice %41 {offsets = [0, 32], sizes = [1, 32], strides = [1, 1]} : vector<1x96xf32> to vector<1x32xf32>
    %53 = arith.addf %51, %52 : vector<1x32xf32>
    %54 = arith.addf %53, %9 : vector<1x32xf32>
    %55 = arith.negf %54 : vector<1x32xf32>
    %56 = math.exp %55 : vector<1x32xf32>
    %cst_37 = arith.constant 1.000000e+00 : f32
    %57 = vector.broadcast %cst_37 : f32 to vector<1x32xf32>
    %58 = arith.addf %57, %56 : vector<1x32xf32>
    %59 = arith.divf %57, %58 : vector<1x32xf32>
    %60 = vector.extract_strided_slice %39 {offsets = [0, 64], sizes = [1, 32], strides = [1, 1]} : vector<1x96xf32> to vector<1x32xf32>
    %61 = arith.addf %60, %10 : vector<1x32xf32>
    %62 = vector.extract_strided_slice %41 {offsets = [0, 64], sizes = [1, 32], strides = [1, 1]} : vector<1x96xf32> to vector<1x32xf32>
    %63 = arith.addf %62, %11 : vector<1x32xf32>
    %64 = arith.mulf %50, %63 : vector<1x32xf32>
    %65 = arith.addf %61, %64 : vector<1x32xf32>
    %66 = math.tanh %65 : vector<1x32xf32>
    %cst_38 = arith.constant 1.000000e+00 : f32
    %67 = vector.broadcast %cst_38 : f32 to vector<1x32xf32>
    %68 = arith.subf %67, %59 : vector<1x32xf32>
    %69 = arith.mulf %68, %66 : vector<1x32xf32>
    %70 = arith.mulf %59, %5 : vector<1x32xf32>
    %71 = arith.addf %69, %70 : vector<1x32xf32>
    %c0_39 = arith.constant 0 : index
    %c0_40 = arith.constant 0 : index
    %72 = vector.load %arg11[%c0_39, %c0_40] : memref<32x64xf32, #tpu.memory_space<vmem>>, vector<32x64xf32>
    %cst_41 = arith.constant dense<0.000000e+00> : vector<1x64xf32>
    %73 = tpu.matmul %71, %72, %cst_41 {dimension_numbers = #tpu.dot_dimension_numbers<[1], [0], [0], [1], [0, 0, 1, 1], [], []>} : vector<1x32xf32>, vector<32x64xf32>, vector<1x64xf32> -> vector<1x64xf32>
    %74 = arith.addf %73, %6 : vector<1x64xf32>
    %cst_42 = arith.constant dense<0xFF800000> : vector<1xf32>
    %75 = vector.multi_reduction <maximumf>, %74, %cst_42 [1] : vector<1x64xf32> to vector<1xf32>
    %76 = vector.shape_cast %75 : vector<1xf32> to vector<1x1xf32>
    %77 = vector.broadcast %76 : vector<1x1xf32> to vector<1x64xf32>
    %78 = arith.subf %74, %77 : vector<1x64xf32>
    %79 = math.exp %78 : vector<1x64xf32>
    %cst_43 = arith.constant dense<0.000000e+00> : vector<1xf32>
    %80 = vector.multi_reduction <add>, %79, %cst_43 [1] : vector<1x64xf32> to vector<1xf32>
    %81 = vector.shape_cast %80 : vector<1xf32> to vector<1x1xf32>
    %82 = math.log %81 : vector<1x1xf32>
    %83 = vector.broadcast %82 : vector<1x1xf32> to vector<1x64xf32>
    %84 = arith.subf %78, %83 : vector<1x64xf32>
    %c0_44 = arith.constant 0 : index
    %c0_45 = arith.constant 0 : index
    %85 = vector.load %arg14[%c0_44, %c0_45] : memref<1x32xf32, #tpu.memory_space<vmem>>, vector<1x32xf32>
    tpu.vector_store %arg14[%c0_44, %c0_45], %71 {strides = array<i32>} : memref<1x32xf32, #tpu.memory_space<vmem>>, vector<1x32xf32>,
    %cst_46 = arith.constant 0.000000e+00 : f32
    %86 = vector.broadcast %cst_46 : f32 to vector<1x1x128xf32>
    %c0_47 = arith.constant 0 : index
    %c0_48 = arith.constant 0 : index
    %c0_49 = arith.constant 0 : index
    %87 = vector.load %arg13[%c0_47, %c0_48, %c0_49] : memref<1x1x128xf32, #tpu.memory_space<vmem>>, vector<1x1x128xf32>
    tpu.vector_store %arg13[%c0_47, %c0_48, %c0_49], %86 {strides = array<i32>} : memref<1x1x128xf32, #tpu.memory_space<vmem>>, vector<1x1x128xf32>,
    %c0_50 = arith.constant 0 : index
    %c0_51 = arith.constant 0 : index
    %c0_52 = arith.constant 0 : index
    %88 = vector.load %arg13[%c0_50, %c0_51, %c0_52] : memref<1x1x128xf32, #tpu.memory_space<vmem>>, vector<1x1x64xf32>
    %89 = vector.shape_cast %88 : vector<1x1x64xf32> to vector<1x64xf32>
    %90 = vector.shape_cast %84 : vector<1x64xf32> to vector<1x1x64xf32>
    tpu.vector_store %arg13[%c0_50, %c0_51, %c0_52], %90 {strides = array<i32>} : memref<1x1x128xf32, #tpu.memory_space<vmem>>, vector<1x1x64xf32>,
    %c0_53 = arith.constant 0 : index
    %c0_54 = arith.constant 0 : index
    %c64_55 = arith.constant 64 : index
    %91 = vector.load %arg13[%c0_53, %c0_54, %c64_55] : memref<1x1x128xf32, #tpu.memory_space<vmem>>, vector<1x1x32xf32>
    %92 = vector.shape_cast %91 : vector<1x1x32xf32> to vector<1x32xf32>
    %93 = vector.shape_cast %71 : vector<1x32xf32> to vector<1x1x32xf32>
    tpu.vector_store %arg13[%c0_53, %c0_54, %c64_55], %93 {strides = array<i32>} : memref<1x1x128xf32, #tpu.memory_space<vmem>>, vector<1x1x32xf32>,
    %c0_56 = arith.constant 0 : index
    %c0_57 = arith.constant 0 : index
    %c96_58 = arith.constant 96 : index
    %94 = vector.load %arg13[%c0_56, %c0_57, %c96_58] : memref<1x1x128xf32, #tpu.memory_space<vmem>>, vector<1x1x5xf32>
    %95 = vector.shape_cast %94 : vector<1x1x5xf32> to vector<1x5xf32>
    %96 = vector.shape_cast %27 : vector<1x5xf32> to vector<1x1x5xf32>
    tpu.vector_store %arg13[%c0_56, %c0_57, %c96_58], %96 {strides = array<i32>} : memref<1x1x128xf32, #tpu.memory_space<vmem>>, vector<1x1x5xf32>,
    return
  }
  func.func @transform_0(%arg0: i32, %arg1: memref<6xi32, #tpu.memory_space<smem>>) -> (i32, i32, i32) {
    %0 = arith.index_cast %arg0 : i32 to index
    %1 = memref.load %arg1[%0] : memref<6xi32, #tpu.memory_space<smem>>
    %c0_i32 = arith.constant 0 : i32
    %c0_i32_0 = arith.constant 0 : i32
    %c0_i32_1 = arith.constant 0 : i32
    return %1, %c0_i32, %c0_i32_0 : i32, i32, i32
  }
  func.func @transform_1(%arg0: i32, %arg1: memref<6xi32, #tpu.memory_space<smem>>) -> (i32, i32) {
    %c0_i32 = arith.constant 0 : i32
    %c0_i32_0 = arith.constant 0 : i32
    %c0_i32_1 = arith.constant 0 : i32
    return %c0_i32, %c0_i32_0 : i32, i32
  }
  func.func @transform_2(%arg0: i32, %arg1: memref<6xi32, #tpu.memory_space<smem>>) -> (i32, i32) {
    %c0_i32 = arith.constant 0 : i32
    %c0_i32_0 = arith.constant 0 : i32
    %c0_i32_1 = arith.constant 0 : i32
    return %c0_i32, %c0_i32_0 : i32, i32
  }
  func.func @transform_3(%arg0: i32, %arg1: memref<6xi32, #tpu.memory_space<smem>>) -> (i32, i32) {
    %c0_i32 = arith.constant 0 : i32
    %c0_i32_0 = arith.constant 0 : i32
    %c0_i32_1 = arith.constant 0 : i32
    return %c0_i32, %c0_i32_0 : i32, i32
  }
  func.func @transform_4(%arg0: i32, %arg1: memref<6xi32, #tpu.memory_space<smem>>) -> (i32, i32) {
    %c0_i32 = arith.constant 0 : i32
    %c0_i32_0 = arith.constant 0 : i32
    %c0_i32_1 = arith.constant 0 : i32
    return %c0_i32, %c0_i32_0 : i32, i32
  }
  func.func @transform_5(%arg0: i32, %arg1: memref<6xi32, #tpu.memory_space<smem>>) -> (i32, i32) {
    %c0_i32 = arith.constant 0 : i32
    %c0_i32_0 = arith.constant 0 : i32
    %c0_i32_1 = arith.constant 0 : i32
    return %c0_i32, %c0_i32_0 : i32, i32
  }
  func.func @transform_6(%arg0: i32, %arg1: memref<6xi32, #tpu.memory_space<smem>>) -> (i32, i32) {
    %c0_i32 = arith.constant 0 : i32
    %c0_i32_0 = arith.constant 0 : i32
    %c0_i32_1 = arith.constant 0 : i32
    return %c0_i32, %c0_i32_0 : i32, i32
  }
  func.func @transform_7(%arg0: i32, %arg1: memref<6xi32, #tpu.memory_space<smem>>) -> (i32, i32) {
    %c0_i32 = arith.constant 0 : i32
    %c0_i32_0 = arith.constant 0 : i32
    %c0_i32_1 = arith.constant 0 : i32
    return %c0_i32, %c0_i32_0 : i32, i32
  }
  func.func @transform_8(%arg0: i32, %arg1: memref<6xi32, #tpu.memory_space<smem>>) -> (i32, i32) {
    %c0_i32 = arith.constant 0 : i32
    %c0_i32_0 = arith.constant 0 : i32
    %c0_i32_1 = arith.constant 0 : i32
    return %c0_i32, %c0_i32_0 : i32, i32
  }
  func.func @transform_9(%arg0: i32, %arg1: memref<6xi32, #tpu.memory_space<smem>>) -> (i32, i32) {
    %c0_i32 = arith.constant 0 : i32
    %c0_i32_0 = arith.constant 0 : i32
    %c0_i32_1 = arith.constant 0 : i32
    return %c0_i32, %c0_i32_0 : i32, i32
  }
  func.func @transform_10(%arg0: i32, %arg1: memref<6xi32, #tpu.memory_space<smem>>) -> (i32, i32) {
    %c0_i32 = arith.constant 0 : i32
    %c0_i32_0 = arith.constant 0 : i32
    %c0_i32_1 = arith.constant 0 : i32
    return %c0_i32, %c0_i32_0 : i32, i32
  }
  func.func @transform_11(%arg0: i32, %arg1: memref<6xi32, #tpu.memory_space<smem>>) -> (i32, i32, i32) {
    %c0_i32 = arith.constant 0 : i32
    %c0_i32_0 = arith.constant 0 : i32
    %c0_i32_1 = arith.constant 0 : i32
    return %arg0, %c0_i32, %c0_i32_0 : i32, i32, i32
  }
}

</mosaic_0001>

<bundles_post_ra>
// kernel: tpu_custom_call.1
= control target key start
LH: loop header
LB: loop body
LE: loop exit
PB: predicated region body
PF: predicated region fallthrough
CT: control target
= control target key end

     0   :  { %s1459_s21 = smov [#allocation4]   ;;  %s1845_s0 = inlined_call_operand.hbm [shape: s32[6], index: 0, kind: input, shape index: {}]   ;;  %s1846_s1 = inlined_call_operand.vmem [shape: f32[64,1,32], index: 1, kind: input, shape index: {}]   ;;  %s1847_s2 = inlined_call_operand.vmem [shape: f32[1,32], index: 2, kind: input, shape index: {}]   ;;  %s1848_s3 = inlined_call_operand.vmem [shape: f32[5,32], index: 3, kind: input, shape index: {}]   ;;  %s1849_s4 = inlined_call_operand.vmem [shape: f32[32,5], index: 4, kind: input, shape index: {}]   ;;  %s1850_s5 = inlined_call_operand.vmem [shape: f32[32,5], index: 5, kind: input, shape index: {}]   ;;  %s1851_s6 = inlined_call_operand.vmem [shape: f32[32,32], index: 6, kind: input, shape index: {}]   ;;  %s1852_s7 = inlined_call_operand.vmem [shape: f32[32,32], index: 7, kind: input, shape index: {}]   ;;  %s1853_s8 = inlined_call_operand.vmem [shape: f32[32,96], index: 8, kind: input, shape index: {}]   ;;  %s1854_s9 = inlined_call_operand.vmem [shape: f32[32,96], index: 9, kind: input, shape index: {}]   ;;  %s1855_s10 = inlined_call_operand.vmem [shape: f32[32,64], index: 10, kind: input, shape index: {}]   ;;  %s1856_s11 = inlined_call_operand.vmem [shape: f32[1,256], index: 11, kind: input, shape index: {}]   ;;  %s1857_s12 = inlined_call_operand.hbm [shape: f32[6,1,128], index: 12, kind: output, shape index: {}]  }
   0x1   :  { %1859 = sst [smem:[#allocation9_spill]] %s1846_s1 }
   0x2   :  { %18 = dma.hbm_to_smem %s1845_s0, 16, %s1459_s21, [#allocation3] }
   0x3   :  { %1437 = dma.done.wait [#allocation3], 16 }
   0x4   :  { %1438 = vsyncadd [#allocation3], 4294967280 }
   0x5   :  { %20 = sfence }
   0x6   :  { %21 = vsyncpa [#allocation6], 0 }
   0x7   :  { %23 = vsyncpa [#allocation6 + $0x1], 0  ;;  %s1534_s24 = smov 0   ;;  %s1536_s25 = smov 0  }
   0x8   :  { %s1538_s26 = smov 0   ;;  %s1540_s27 = smov 0  }
   0x9 LB: > { %s1555_s0 = sadd.s32 4294967295, %s1457_s27   ;;  %s1186_s28 = sadd.s32 4294967294, %s1457_s27   ;;  %s1457_s27 = sphi %s1540_s27, %s1869_s27   ;;  %s1453_s26 = sphi %s1538_s26, %s1868_s26   ;;  %s1449_s25 = sphi %s1536_s25, %s1867_s25   ;;  %s1445_s24 = sphi %s1534_s24, %s1866_s24  }
   0xa   : > { %s1559_s29 = sadd.s32 1, %s1457_s27   ;;  %s274_s30 = sadd.s32 1, %s1453_s26 }
   0xb   : > { %s271_s13 = ssub.s32 %s1457_s27, %s1559_s29  ;;  %p284_p0 = scmp.ne.s32.totalorder %s1453_s26, %s1449_s25 }
   0xc   : > { %p272_p1 = scmp.eq.s32.totalorder %s271_s13, 0  ;;  %p285_p2 = scmp.eq.s32.totalorder %s1555_s0, 5 }
   0xd   : > { %p290_p3 = scmp.ne.s32.totalorder %s1449_s25, %s1445_s24  ;;  %p291_p4 = scmp.eq.s32.totalorder %s1186_s28, 5 }
   0xe   : > { %s1570_s14 = scalar_select %p272_p1, %s1453_s26, %s274_s30  }
   0xf   : > { %p1572_p5 = por %p285_p2, %p284_p0  ;;  %p1576_p6 = por %p291_p4, %p290_p3 }
  0x10   : > { %p1189_p7 = scmp.ge.s32.totalorder %s1457_s27, 1  ;;  %p347_p8 = scmp.lt.s32.totalorder %s1457_s27, 7 }
  0x12   : > { %p348_p9 = pnand %p1189_p7, %p347_p8 }
  0x13   : > { %s1858_s17 = sand.u32 (!%p348_p9), 1, %s1449_s25   ;;  %s385_s18 = sld [smem:[#allocation4 + %s1555_s0]] (!%p348_p9) }
  0x14   : > { %351 = sbr.rel (%p348_p9) target bundleno = 2063 (0x80f), region = 64  ;;  %s1592_s22 = scalar_lea.vmem (!%p348_p9), [#allocation5], %s1858_s17 }
  0x15   : > { %p1190_p11 = scmp.ne.s32.totalorder (!%p348_p9), %s1555_s0, 0 }
  0x19   : > { %p386_p10 = scmp.lt.s32.totalorder %s385_s18, 63  ;;  %393 = sbr.rel (%p1190_p11) target bundleno = 32 (0x20), region = 68 }
  0x1b   : > { %s1871_s18 = smov (!%p386_p10, %s385_s18), 63 }
  0x1e   : > { %v394_v0 = vld [vmem:[%s1847_s2] sm:$0x1]  ;;  %vm395_vm0 = vcmask 253952  }
  0x1f   : > { %396 = vst.msk [vmem:[#allocation2] sm:$0x1] %vm395_vm0, %v394_v0 }
  0x20 PF: > { %v408_v1 = vld [vmem:[%s1850_s5 + $0x18] sm:$0xff]  ;;  %v557_v3 = vlaneseq  ;;  %v1460_v4 = vmov 0.0   ;;  %v407_v5 = vld [vmem:[%s1850_s5 + $0x10] sm:$0xff]  ;;  %v406_v8 = vld [vmem:[%s1850_s5 + $0x8] sm:$0xff]  ;;  %vm409_vm1 = vcmask 261120   ;;  %s1863_s1 = sld [smem:[#allocation9_spill]] }
  0x21   : > { %v404_v2 = vld [vmem:[%s1849_s4 + $0x18] sm:$0xff]  ;;  %1242 = vmatprep.subr.mxu0 %v1460_v4  ;;  %1109 = vst [vmem:[%s1592_s22] sm:$0x1] %v1460_v4  ;;  %1253 = vmatprep.subr.mxu1 %v1460_v4  ;;  %v403_v6 = vld [vmem:[%s1849_s4 + $0x10] sm:$0xff]  ;;  %v402_v9 = vld [vmem:[%s1849_s4 + $0x8] sm:$0xff]  ;;  %vm1461_vm2 = vmmov 0   ;;  %vm565_vm3 = vcmask 32768  }
  0x22   : > { %1243 = vmatpush3.msra.mxu0 %v408_v1  ;;  %1254 = vmatpush3.msra.mxu1 %v404_v2  ;;  %v558_v7 = vshrl.u32 %v557_v3, 7  ;;  %v1625_v10 = vld [vmem:[%s1856_s11 + $0x1] sm:$0x1]  ;;  %vm582_vm4 = vcmask 1044480   ;;  %v663_v31 = vld [vmem:[%s1852_s7 + $0x18] sm:$0xff]  ;;  %v662_v32 = vld [vmem:[%s1852_s7 + $0x10] sm:$0xff] }
  0x23   : > { %1244 = vmatprep.subr.mxu0 %v1460_v4  ;;  %1255 = vmatprep.subr.mxu1 %v1460_v4  ;;  %v405_v12 = vld [vmem:[%s1850_s5] sm:$0xff]  ;;  %v661_v33 = vld [vmem:[%s1852_s7 + $0x8] sm:$0xff]  ;;  %vm578_vm5 = vcmask 39936   ;;  %v659_v37 = vld [vmem:[%s1851_s6 + $0x18] sm:$0xff]  ;;  %s1463_s30 = smov 64   ;;  %s1464_s20 = smov 96  }
  0x24   : > { %1245 = vmatpush3.msra.mxu0 %v407_v5  ;;  %1256 = vmatpush3.msra.mxu1 %v403_v6  ;;  %v1627_v11 = vsub.s32 0, %v558_v7  ;;  %v401_v13 = vld [vmem:[%s1849_s4] sm:$0xff]  ;;  %v658_v38 = vld [vmem:[%s1851_s6 + $0x10] sm:$0xff]  ;;  %v657_v39 = vld [vmem:[%s1851_s6 + $0x8] sm:$0xff]  ;;  %vm1107_vm6 = vcmask 253952   ;;  %vm1093_vm7 = vcmask 516096  }
  0x25   : > { %1246 = vmatprep.subr.mxu0 %v1460_v4  ;;  %1257 = vmatprep.subr.mxu1 %v1460_v4  ;;  %v577_v30 = vld [vmem:[%s1848_s3] sm:$0x1f]  ;;  %v897_v43 = vld [vmem:[%s1854_s9 + $0x18] sm:$0xff]  ;;  %v896_v44 = vld [vmem:[%s1854_s9 + $0x10] sm:$0xff]  ;;  %vm1114_vm8 = vcmask 778752   ;;  %vm1119_vm9 = vcmask 819968  }
  0x26   : > { %1247 = vmatpush3.msra.mxu0 %v406_v8  ;;  %1258 = vmatpush3.msra.mxu1 %v402_v9  ;;  %v1639_v14 = vld [vmem:[#allocation2] sm:$0x1]  ;;  %s1864_s17 = scalar_lea.vmem %s1863_s1, %s1871_s18  ;;  %v560_v16 = vrot.slane %v1625_v10, %v1627_v11  ;;  %s1462_s18 = smov 32   ;;  %v895_v46 = vld [vmem:[%s1854_s9 + $0x8] sm:$0xff]  ;;  %v820_v52 = vld [vmem:[%s1853_s8 + $0x18] sm:$0xff] }
  0x27   : > { %1248 = vmatprep.subr.mxu0 %v1460_v4  ;;  %1259 = vmatprep.subr.mxu1 %v1460_v4  ;;  %v1646_v15 = vld [vmem:[%s1864_s17] sm:$0x1]  ;;  %v819_v53 = vld [vmem:[%s1853_s8 + $0x10] sm:$0xff]  ;;  %v818_v54 = vld [vmem:[%s1853_s8 + $0x8] sm:$0xff]  ;;  %v1008_v56 = vrot.slane %v1639_v14, %v1627_v11  ;;  %s1134_s17 = sshll.u32 %s1592_s22, 4  ;;  %s1465_s19 = smov [#allocation5]   ;;  %s1802_s17 = int_to_ptr.vmem [resolvable:$true] %s1134_s17 }
  0x28   : > { %1249 = vmatpush3.msra.mxu0 %v405_v12  ;;  %1250 = vmatprep.mubr.msk.f32.mxu0 %vm1461_vm2, %v1460_v4  ;;  %v656_v40 = vld [vmem:[%s1851_s6] sm:$0xff] }
  0x29   : > { %1260 = vmatpush3.msra.mxu1 %v401_v13  ;;  %1261 = vmatprep.mubr.msk.f32.mxu1 %vm1461_vm2, %v1460_v4  ;;  %v660_v41 = vld [vmem:[%s1852_s7] sm:$0xff] }
  0x2a   : > { %1251 = vmatmul.mubr.msk.f32.vlgmr.msra.gmra.mxu0 %vm409_vm1, %v1639_v14  ;;  %1262 = vmatmul.mubr.msk.f32.vlgmr.msra.gmra.mxu1 %vm409_vm1, %v1646_v15  ;;  %v1716_v42 = vld [vmem:[%s1856_s11] sm:$0x1] }
  0x2b   : > { %561 = vrot.lane.b32.xlu0 %v560_v16, %s1462_s18  ;;  %1264 = vmatprep.subr.mxu0 %v1460_v4  ;;  %v811_v45 = vrot.slane %v1716_v42, %v1627_v11  ;;  %v894_v47 = vld [vmem:[%s1854_s9] sm:$0xff] }
  0x2c   : > { %1266 = vmatprep.mubr.msk.f32.mxu0 %vm1461_vm2, %v1460_v4  ;;  %1269 = vmatprep.subr.mxu1 %v1460_v4  ;;  %v817_v55 = vld [vmem:[%s1853_s8] sm:$0xff] }
  0x2d   : > { %1277 = vmatprep.mubr.msk.f32.mxu1 %vm1461_vm2, %v1460_v4  ;;  %1265 = vmatpush3.msk.msra.mxu0 %vm582_vm4, %v577_v30 }
  0x2e   : > { %1280 = vmatprep.subr.mxu0 %v1460_v4  ;;  %1270 = vmatpush3.msra.mxu1 %v663_v31 }
  0x2f   : > { %1271 = vmatprep.subr.mxu1 %v1460_v4 }
  0x30   : > { %1272 = vmatpush3.msra.mxu1 %v662_v32 }
  0x31   : > { %1273 = vmatprep.subr.mxu1 %v1460_v4 }
  0x32   : > { %1274 = vmatpush3.msra.mxu1 %v661_v33 }
  0x33   : > { %1275 = vmatprep.subr.mxu1 %v1460_v4 }
  0x34   : > { %1276 = vmatpush3.msra.mxu1 %v660_v41 }
  0x35   : > { %1291 = vmatprep.subr.mxu1 %v1460_v4 }
  0x9d   : > { %v1665_v17 = vpop.permute.xlu0 %561 }
  0xea   : > { %v479_v18 = vpop.f32.mrf.mxu0  ;;  %v552_v19 = vpop.f32.mrf.mxu1 }
  0xeb   : > { %v553_v20 = vadd.f32 %v552_v19, %v479_v18  ;;  %v1017_v18 = vld [vmem:[%s1855_s10 + $0x18] sm:$0xff]  ;;  %v1016_v19 = vld [vmem:[%s1855_s10 + $0x10] sm:$0xff] }
  0xec   : > { %v1252_v21 = vpop.f32.mrf.mxu0  ;;  %v1263_v22 = vpop.f32.mrf.mxu1 }
  0xed   : > { %v564_v23 = vadd.f32 %v1665_v17, %v553_v20  ;;  %v1015_v20 = vld [vmem:[%s1855_s10 + $0x8] sm:$0xff]  ;;  %v1014_v21 = vld [vmem:[%s1855_s10] sm:$0xff] }
  0xef   : > { %v566_v24 = vsel %vm565_vm3, %v564_v23, -inf }
  0xf0   : > { %567 = vmax.xlane.f32.xlu0 %v566_v24 }
 0x106   : > { %1009 = vrot.lane.b32.xlu0 %v1008_v56, %s1462_s18 }
 0x179   : > { %v568_v25 = vpop.xlane.xlu0 %567 }
 0x17a   : > { %v569_v26 = vsub.f32 %v564_v23, %v568_v25 }
 0x17c   : > { %v570_v27 = vmul.f32 1.442695, %v569_v26 }
 0x17e   : > { %1369 = vpow2.f32 %v570_v27 }
 0x18b   : > { %v1370_v28 = vpop.eup %1369 }
 0x18c   : > { %v572_v29 = vsel %vm565_vm3, %v1370_v28, 0.0 }
 0x18d   : > { %573 = vadd.xlane.f32.xlu1 %v572_v29 }
 0x19e   : > { %812 = vrot.lane.b32.xlu1 %v811_v45, %s1463_s30 }
 0x1a2   : > { %969 = vrot.lane.b32.xlu1 %v811_v45, %s1462_s18 }
 0x216   : > { %v574_v34 = vpop.xlane.xlu1 %573 }
 0x217   : > { %1371 = vrcp.f32 %v574_v34 }
 0x21a   : > { %v813_v61 = vpop.permute.xlu1 %812 }
 0x21e   : > { %v970_v3 = vpop.permute.xlu1 %969 }
 0x224   : > { %v1372_v35 = vpop.eup %1371 }
 0x225   : > { %v1684_v36 = vmul.f32 %v1372_v35, %v1370_v28  ;;  %v1010_v28 = vpop.permute.xlu0 %1009 }
 0x227   : > { %1267 = vmatmul.mubr.msk.f32.vlgmr.msra.gmra.mxu0 %vm578_vm5, %v1684_v36 }
 0x228   : > { %1281 = vmatpush3.msra.mxu0 %v659_v37  ;;  %1288 = vmatprep.mubr.msk.f32.mxu0 %vm1461_vm2, %v1460_v4 }
 0x229   : > { %1282 = vmatprep.subr.mxu0 %v1460_v4 }
 0x22a   : > { %1283 = vmatpush3.msra.mxu0 %v658_v38 }
 0x22b   : > { %1284 = vmatprep.subr.mxu0 %v1460_v4 }
 0x22c   : > { %1285 = vmatpush3.msra.mxu0 %v657_v39 }
 0x22d   : > { %1286 = vmatprep.subr.mxu0 %v1460_v4 }
 0x22e   : > { %1287 = vmatpush3.msra.mxu0 %v656_v40 }
 0x22f   : > { %1289 = vmatmul.mubr.msk.f32.vlgmr.msra.gmra.mxu0 %vm409_vm1, %v1646_v15  ;;  %1302 = vmatprep.subr.mxu0 %v1460_v4 }
 0x230   : > { %1310 = vmatprep.mubr.msk.f32.mxu0 %vm1461_vm2, %v1460_v4  ;;  %1303 = vmatpush3.msra.mxu0 %v897_v43 }
 0x231   : > { %1304 = vmatprep.subr.mxu0 %v1460_v4 }
 0x232   : > { %1305 = vmatpush3.msra.mxu0 %v896_v44 }
 0x233   : > { %1306 = vmatprep.subr.mxu0 %v1460_v4 }
 0x234   : > { %1307 = vmatpush3.msra.mxu0 %v895_v46 }
 0x235   : > { %1308 = vmatprep.subr.mxu0 %v1460_v4 }
 0x236   : > { %1309 = vmatpush3.msra.mxu0 %v894_v47 }
 0x237   : > { %1311 = vmatmul.mubr.msk.f32.vlgmr.msra.gmra.mxu0 %vm409_vm1, %v1639_v14 }
 0x2e7   : > { %v652_v48 = vpop.f32.mrf.mxu0 }
 0x2e8   : > { %1278 = vmatmul.mubr.msk.f32.vlgmr.msra.gmra.mxu1 %vm409_vm1, %v652_v48 }
 0x2e9   : > { %v1268_v49 = vpop.f32.mrf.mxu0  ;;  %1299 = vmatprep.mubr.msk.f32.mxu1 %vm1461_vm2, %v1460_v4  ;;  %1292 = vmatpush3.msra.mxu1 %v820_v52 }
 0x2ea   : > { %1293 = vmatprep.subr.mxu1 %v1460_v4 }
 0x2eb   : > { %1294 = vmatpush3.msra.mxu1 %v819_v53 }
 0x2ec   : > { %1295 = vmatprep.subr.mxu1 %v1460_v4 }
 0x2ed   : > { %1296 = vmatpush3.msra.mxu1 %v818_v54 }
 0x2ee   : > { %1297 = vmatprep.subr.mxu1 %v1460_v4 }
 0x2ef   : > { %v803_v50 = vpop.f32.mrf.mxu0  ;;  %1298 = vmatpush3.msra.mxu1 %v817_v55 }
 0x2f0   : > { %1313 = vmatprep.subr.mxu1 %v1460_v4 }
 0x2f1   : > { %v1290_v51 = vpop.f32.mrf.mxu0 }
 0x2f7   : > { %v964_v57 = vpop.f32.mrf.mxu0 }
 0x2f8   : > { %v987_v58 = vadd.f32 %v964_v57, %v1625_v10 }
 0x2f9   : > { %v1312_v59 = vpop.f32.mrf.mxu0 }
 0x2fa   : > { %989 = vrot.lane.b32.xlu1 %v987_v58, %s1463_s30 }
 0x36c   : > { %v990_v11 = vpop.permute.xlu1 %989 }
 0x3a8   : > { %v733_v60 = vpop.f32.mrf.mxu1 }
 0x3a9   : > { %v804_v62 = vadd.f32 %v803_v50, %v733_v60 }
 0x3aa   : > { %v1279_v63 = vpop.f32.mrf.mxu1 }
 0x3ab   : > { %v815_v0 = vadd.f32 %v813_v61, %v804_v62 }
 0x3ad   : > { %v816_v1 = vmax.f32 %v815_v0, 0.0 }
 0x3af   : > { %1300 = vmatmul.mubr.msk.f32.vlgmr.msra.gmra.mxu1 %vm409_vm1, %v816_v1 }
 0x3b0   : > { %1321 = vmatprep.mubr.msk.f32.mxu1 %vm1461_vm2, %v1460_v4  ;;  %1314 = vmatpush3.msra.mxu1 %v1017_v18 }
 0x3b1   : > { %1315 = vmatprep.subr.mxu1 %v1460_v4 }
 0x3b2   : > { %1316 = vmatpush3.msra.mxu1 %v1016_v19 }
 0x3b3   : > { %1317 = vmatprep.subr.mxu1 %v1460_v4 }
 0x3b4   : > { %1318 = vmatpush3.msra.mxu1 %v1015_v20 }
 0x3b5   : > { %1319 = vmatprep.subr.mxu1 %v1460_v4 }
 0x3b6   : > { %1320 = vmatpush3.msra.mxu1 %v1014_v21 }
 0x46f   : > { %v890_v2 = vpop.f32.mrf.mxu1 }
 0x470   : > { %v968_v5 = vadd.f32 %v964_v57, %v890_v2  ;;  %v986_v14 = vadd.f32 %v890_v2, %v1665_v17 }
 0x471   : > { %v1301_v6 = vpop.f32.mrf.mxu1 }
 0x472   : > { %v972_v7 = vadd.f32 %v970_v3, %v968_v5  ;;  %v979_v23 = vadd.f32 %v968_v5, %v1665_v17 }
 0x474   : > { %v1199_v8 = vmul.f32 -1.442695, %v972_v7  ;;  %v1200_v24 = vmul.f32 -1.442695, %v979_v23 }
 0x476   : > { %1373 = vpow2.f32 %v1199_v8 }
 0x483   : > { %v1374_v9 = vpop.eup %1373 }
 0x484   : > { %v976_v10 = vadd.f32 1.0, %v1374_v9 }
 0x486   : > { %1375 = vrcp.f32 %v976_v10 }
 0x493   : > { %v1376_v12 = vpop.eup %1375 }
 0x494   : > { %v992_v13 = vmul.f32 %v1376_v12, %v990_v11 }
 0x496   : > { %994 = vrot.lane.b32.xlu1 %v992_v13, %s1463_s30  ;;  %s1395_s30 = scalar_lea.vmem %s1802_s17, 16 }
 0x497   : > { %p1396_p12 = scmp.ne.s32.totalorder %s1802_s17, %s1395_s30 }
 0x499   : > { %p1397_p13 = pnand %p1396_p12, %p1572_p5 }
 0x49b   : > { %p1398_p0 = pneg %p1397_p13 }
 0x508   : > { %v995_v15 = vpop.permute.xlu1 %994 }
 0x509   : > { %v997_v16 = vadd.f32 %v995_v15, %v986_v14 }
 0x50b   : > { %1377 = vtanh.f32 %v997_v16 }
 0x50c   : > { %1379 = vpow2.f32 %v1200_v24 }
 0x518   : > { %v1378_v22 = vpop.eup %1377 }
 0x519   : > { %1001 = vrot.lane.b32.xlu1 %v1378_v22, %s1464_s20  ;;  %v1380_v25 = vpop.eup %1379 }
 0x51a   : > { %v983_v26 = vadd.f32 1.0, %v1380_v25 }
 0x51c   : > { %1381 = vrcp.f32 %v983_v26 }
 0x529   : > { %v1382_v27 = vpop.eup %1381 }
 0x52a   : > { %v999_v29 = vsub.f32 1.0, %v1382_v27  ;;  %v1012_v31 = vmul.f32 %v1382_v27, %v1010_v28 }
 0x58b   : > { %v1002_v30 = vpop.permute.xlu1 %1001 }
 0x58c   : > { %v1004_v32 = vmul.f32 %v1002_v30, %v999_v29 }
 0x58e   : > { %v1013_v33 = vadd.f32 %v1012_v31, %v1004_v32 }
 0x590   : > { %1019 = vrot.lane.b32.xlu1 %v1013_v33, %s1464_s20 }
 0x602   : > { %v1020_v4 = vpop.permute.xlu1 %1019 }
 0x603   : > { %1108 = vst.msk [vmem:[#allocation2] sm:$0x1] %vm1107_vm6, %v1020_v4  ;;  %1322 = vmatmul.mubr.msk.f32.vlgmr.msra.gmra.mxu1 %vm409_vm1, %v1020_v4 }
 0x6c3   : > { %v1089_v17 = vpop.f32.mrf.mxu1 }
 0x6c4   : > { %v1090_v34 = vadd.f32 %v1089_v17, %v1716_v42 }
 0x6c5   : > { %v1323_v35 = vpop.f32.mrf.mxu1 }
 0x6c6   : > { %v1094_v37 = vsel %vm1093_vm7, %v1090_v34, -inf }
 0x6c7   : > { %1095 = vmax.xlane.f32.xlu1 %v1094_v37 }
 0x6d8   : > { %1111 = vrot.lane.b32.xlu1 %v1013_v33, %s1462_s18  ;;  %s1202_s18 = sshll.u32 %s1555_s0, 4  ;;  %s1865_s0 = sand.u32 1, %s1449_s25  }
 0x6d9   : > { %s1800_s21 = scalar_lea.hbm %s1857_s12, %s1202_s18  ;;  %s1122_s13 = scalar_lea.sflag [#allocation6], %s1865_s0 }
 0x750   : > { %v1096_v38 = vpop.xlane.xlu1 %1095 }
 0x751   : > { %v1097_v39 = vsub.f32 %v1090_v34, %v1096_v38 }
 0x753   : > { %v1098_v40 = vmul.f32 1.442695, %v1097_v39 }
 0x754   : > { %v1112_v47 = vpop.permute.xlu1 %1111 }
 0x755   : > { %1383 = vpow2.f32 %v1098_v40 }
 0x762   : > { %v1384_v41 = vpop.eup %1383 }
 0x763   : > { %v1100_v43 = vsel %vm1093_vm7, %v1384_v41, 0.0 }
 0x764   : > { %1101 = vadd.xlane.f32.xlu0 %v1100_v43 }
 0x77a   : > { %1116 = vrot.lane.b32.xlu0 %v1684_v36, %s1464_s20  ;;  %s1399_s20 = sshll.u32 %s1465_s19, 4  ;;  %s1400_s20 = int_to_ptr.vmem [resolvable:$false] %s1399_s20 }
 0x77b   : > { %s1401_s18 = scalar_lea.vmem %s1400_s20, 32  ;;  %p1402_p1 = scmp.lt.s32.totalorder %s1802_s17, %s1400_s20 }
 0x77c   : > { %p1403_p2 = scmp.lt.s32.totalorder %s1401_s18, %s1395_s30 }
 0x77e   : > { %p1404_p3 = por %p1403_p2, %p1402_p1 }
 0x780   : > { %p1405_p4 = pnand %p1404_p3, %p1398_p0 }
 0x7ed   : > { %v1102_v42 = vpop.xlane.xlu0 %1101 }
 0x7ee   : > { %1385 = vlog2.f32 %v1102_v42 }
 0x7f1   : > { %v1117_v36 = vpop.permute.xlu0 %1116 }
 0x7fb   : > { %v1386_v44 = vpop.eup %1385 }
 0x7fc   : > { %v1104_v45 = vmul.f32 0.6931472, %v1386_v44 }
 0x7fe   : > { %v1105_v46 = vsub.f32 %v1097_v39, %v1104_v45 }
 0x800   : > { %1110 = vst.msk [vmem:[%s1592_s22] sm:$0x1] %vm1093_vm7, %v1105_v46 }
 0x801   : > { %1115 = vst.msk [vmem:[%s1592_s22] sm:$0x1] %vm1114_vm8, %v1112_v47 }
 0x802   : > { %1120 = vst.msk [vmem:[%s1592_s22] sm:$0x1] %vm1119_vm9, %v1117_v36 }
 0x803   : > { %1408 = shalt.err (!%p1405_p4)
}
 0x804   : > { %s1409_s22 = scalar_lea.hbm %s1800_s21, 16  ;;  %s1413_s0 = scalar_lea.hbm %s1857_s12, 96 }
 0x805   : > { %p1410_p7 = scmp.ne.s32.totalorder %s1800_s21, %s1409_s22  ;;  %p1414_p10 = scmp.lt.s32.totalorder %s1800_s21, %s1857_s12 }
 0x806   : > { %p1415_p11 = scmp.lt.s32.totalorder %s1413_s0, %s1409_s22 }
 0x807   : > { %p1411_p8 = pnand %p1410_p7, %p1572_p5 }
 0x808   : > { %p1416_p12 = por %p1415_p11, %p1414_p10 }
 0x809   : > { %p1412_p9 = pneg %p1411_p8 }
 0x80b   : > { %p1417_p13 = pnand %p1416_p12, %p1412_p9 }
 0x80d   : > { %1420 = shalt.err (!%p1417_p13)
}
 0x80e   : > { %1324 = dma.vmem_to_hbm [thread:$0]  (%p1572_p5), %s1802_s17, 16, %s1800_s21, %s1122_s13  }
 0x80f PF: > { %p1330_p0 = scmp.ge.s32.totalorder %s1457_s27, 2  ;;  %s1146_s30 = sand.u32 1, %s1445_s24  }
 0x810   : > { %s1147_s1 = scalar_lea.sflag [#allocation6], %s1146_s30 }
 0x811   : > { %p1327_p1 = pnand %p1330_p0, %p1576_p6 }
 0x813   : > { %p1328_p2 = pneg %p1327_p1 }
 0x815   : > { %1440 = dma.done.wait (%p1328_p2), %s1147_s1, 16  }
 0x816   : > { %1442 = vsyncadd (%p1328_p2), %s1147_s1, 4294967280  ;;  %p26_p3 = scmp.ge.s32.totalorder %s1559_s29, 8   ;;  %s1866_s24 = smov %s1449_s25 }
 0x817   : > { %s1867_s25 = smov %s1453_s26  ;;  %s1868_s26 = smov %s1570_s14 }
 0x818   : > { %s1869_s27 = smov %s1559_s29  ;;  %28 = sbr.rel (!%p26_p3) target bundleno = 9 (0x9), region = 103 }
 0x81d   :  { %1151 = vsyncpa [#allocation6], 1 }
 0x81e   :  { %1153 = vsyncpa [#allocation6 + $0x1], 1 }

</bundles_post_ra>
